<compile_context>
chip_gen: v5e
topology: v5e:2x2
jax: 0.10.0
libtpu: 0.0.40
codegen_flags: <defaults>
</compile_context>

<pallas_src>
import functools
import math

import jax
import jax.numpy as jnp
import numpy as np
from jax.experimental import pallas as pl
from jax.experimental.pallas import tpu as pltpu

LN_EPS = 1e-5


@functools.lru_cache(maxsize=None)
def _vmem_limit_bytes():
    """Generation-aware VMEM budget: ~3/4 of physical, capped at 112 MiB."""
    try:
        cap = int(pltpu.get_tpu_info().vmem_capacity_bytes)
    except Exception:                       # conservative fallback (v7x-sized)
        cap = 64 * 1024 * 1024
    return int(min(cap * 3 // 4, 112 * 1024 * 1024))


def _cparams(dims):
    return pltpu.CompilerParams(dimension_semantics=dims,
                                vmem_limit_bytes=_vmem_limit_bytes())


def _round_up(x, m):
    return (x + m - 1) // m * m


def _pad_rows(a, n_pad):
    n = a.shape[0]
    if n_pad == n:
        return a
    return jnp.pad(a, [(0, n_pad - n)] + [(0, 0)] * (a.ndim - 1))


def _seq_tile(q_len, cap=128):
    # largest divisor of q_len that is <= cap (keeps attention tiling exact)
    t = min(cap, q_len)
    while q_len % t:
        t -= 1
    return t


# ----------------------------- in-kernel math --------------------------------

def _layernorm(x, gamma, beta, eps):
    xf = x.astype(jnp.float32)
    mu = jnp.mean(xf, axis=-1, keepdims=True)
    var = jnp.mean((xf - mu) ** 2, axis=-1, keepdims=True)
    return (xf - mu) * jax.lax.rsqrt(var + eps) * gamma + beta


def _softmax_lastdim(s):
    m = jnp.max(s, axis=-1, keepdims=True)
    p = jnp.exp(s - m)
    return p / jnp.sum(p, axis=-1, keepdims=True)


# ----------------------------- anchor-layer kernels --------------------------

def _ln_qkv_kernel(x_ref, g_ref, b_ref, w_ref, bias_ref,
                   oq_ref, ok_ref, ov_ref, *, eps, hidden):
    # LN in f32, matmul in bf16 with f32 accumulation; q/k/v written as three
    # lane-dense (tm, H) blocks (no head transposes in HBM).
    h = _layernorm(x_ref[...], g_ref[...], b_ref[...], eps).astype(jnp.bfloat16)
    y = jnp.dot(h, w_ref[...], preferred_element_type=jnp.float32) + bias_ref[...]
    oq_ref[...] = y[:, :hidden].astype(oq_ref.dtype)
    ok_ref[...] = y[:, hidden:2 * hidden].astype(ok_ref.dtype)
    ov_ref[...] = y[:, 2 * hidden:].astype(ov_ref.dtype)


def _proj_kernel(a_ref, w_ref, bias_ref, o_ref):
    y = jnp.dot(a_ref[...].astype(jnp.bfloat16), w_ref[...],
                preferred_element_type=jnp.float32) + bias_ref[...]
    o_ref[...] = y.astype(o_ref.dtype)


# ----------------------------- expert (MoT) kernels --------------------------

def _mot_qkv_kernel(x_ref, rw_ref, rb_ref, g_ref, b_ref, w_ref, wb_ref,
                    oq_ref, ok_ref, ov_ref, os_ref, *, eps, num_attn, hidden):
    xf = x_ref[...].astype(jnp.float32)

    # naive_softmax router on the raw (pre-LN) hidden state (fused; f32).
    logits = jnp.dot(xf, rw_ref[...],
                     preferred_element_type=jnp.float32) + rb_ref[...]
    scores = _softmax_lastdim(logits)                               # (tm, E)
    os_ref[...] = scores.astype(os_ref.dtype)

    # LayerNorm statistics are expert-independent: compute once per tile;
    # only gamma_e / beta_e differ per expert.
    mu = jnp.mean(xf, axis=-1, keepdims=True)
    var = jnp.mean((xf - mu) ** 2, axis=-1, keepdims=True)
    xn = (xf - mu) * jax.lax.rsqrt(var + eps)

    # Dense mixture (routing_all_possible_path=True, use_ste forward = identity).
    # The routing score is folded into the matmul LHS so the MXU does the
    # scaling: sum_e dot(score_e * LN_e(x), W_e) + score_e * b_e.
    acc = jnp.zeros((xn.shape[0], 3 * hidden), jnp.float32)
    for e in range(num_attn):                      # static unroll over experts
        h = xn * g_ref[e] + b_ref[e]                               # (tm, H) f32
        h = (h * scores[:, e:e + 1]).astype(jnp.bfloat16)
        acc = acc + jnp.dot(h, w_ref[e], preferred_element_type=jnp.float32)
        acc = acc + scores[:, e:e + 1] * wb_ref[e]

    oq_ref[...] = acc[:, :hidden].astype(oq_ref.dtype)
    ok_ref[...] = acc[:, hidden:2 * hidden].astype(ok_ref.dtype)
    ov_ref[...] = acc[:, 2 * hidden:].astype(ov_ref.dtype)


def _mot_proj_kernel(a_ref, s_ref, w_ref, wb_ref, o_ref, *, num_attn):
    a = a_ref[...].astype(jnp.float32)
    scores = s_ref[...]                                            # (tm, E) f32
    acc = jnp.zeros((a.shape[0], o_ref.shape[-1]), jnp.float32)
    for e in range(num_attn):
        ae = (a * scores[:, e:e + 1]).astype(jnp.bfloat16)
        acc = acc + jnp.dot(ae, w_ref[e], preferred_element_type=jnp.float32)
        acc = acc + scores[:, e:e + 1] * wb_ref[e]
    o_ref[...] = acc.astype(o_ref.dtype)


# ----------------------------- flash attention kernel ------------------------

def _flash_attn_kernel(q_ref, k_ref, v_ref, o_ref, m_scr, l_scr, acc_scr, *,
                       scale, num_heads, head_dim, tq, tk):
    qi = pl.program_id(1)
    ki = pl.program_id(2)

    @pl.when(ki == 0)
    def _():
        m_scr[...] = jnp.full_like(m_scr, -jnp.inf)
        l_scr[...] = jnp.zeros_like(l_scr)
        acc_scr[...] = jnp.zeros_like(acc_scr)

    # kv tiles strictly above the diagonal are fully masked -> skip (tq == tk)
    @pl.when(ki <= qi)
    def _():
        q = q_ref[...].astype(jnp.bfloat16)
        k = k_ref[...].astype(jnp.bfloat16)
        v = v_ref[...].astype(jnp.bfloat16)
        q_pos = qi * tq + jax.lax.broadcasted_iota(jnp.int32, (tq, tk), 0)
        k_pos = ki * tk + jax.lax.broadcasted_iota(jnp.int32, (tq, tk), 1)
        causal = k_pos <= q_pos
        neg = jnp.finfo(jnp.float32).min   # diagonal always unmasked -> no NaN
        for h in range(num_heads):         # heads as static in-kernel loop
            sl = slice(h * head_dim, (h + 1) * head_dim)
            s = jax.lax.dot_general(q[:, sl], k[:, sl],
                                    (((1,), (1,)), ((), ())),
                                    preferred_element_type=jnp.float32) * scale
            s = jnp.where(causal, s, neg)
            m_prev = m_scr[:, h:h + 1]
            m_new = jnp.maximum(m_prev, jnp.max(s, axis=-1, keepdims=True))
            alpha = jnp.exp(m_prev - m_new)
            p = jnp.exp(s - m_new)
            l_scr[:, h:h + 1] = (alpha * l_scr[:, h:h + 1]
                                 + jnp.sum(p, axis=-1, keepdims=True))
            acc_scr[:, sl] = alpha * acc_scr[:, sl] + jnp.dot(
                p.astype(jnp.bfloat16), v[:, sl],
                preferred_element_type=jnp.float32)
            m_scr[:, h:h + 1] = m_new

    @pl.when(ki == pl.num_programs(2) - 1)
    def _():
        inv_l = pl.reciprocal(l_scr[...], approx=True)             # (tq, NH)
        for h in range(num_heads):
            sl = slice(h * head_dim, (h + 1) * head_dim)
            o_ref[:, sl] = (acc_scr[:, sl] * inv_l[:, h:h + 1]).astype(o_ref.dtype)


def _causal_mha(q2d, k2d, v2d, bsz, q_len, num_heads, head_dim):
    """Flash-style causal MHA over merged-head (N, H) buffers."""
    hidden = num_heads * head_dim
    t = _seq_tile(q_len)
    nq = q_len // t
    scale = 1.0 / math.sqrt(head_dim)

    q_spec = pl.BlockSpec((t, hidden), lambda b, qi, ki: (b * nq + qi, 0))
    kv_spec = pl.BlockSpec((t, hidden), lambda b, qi, ki: (b * nq + ki, 0))

    return pl.pallas_call(
        functools.partial(_flash_attn_kernel, scale=scale, num_heads=num_heads,
                          head_dim=head_dim, tq=t, tk=t),
        out_shape=jax.ShapeDtypeStruct((bsz * q_len, hidden), jnp.bfloat16),
        grid=(bsz, nq, nq),
        in_specs=[q_spec, kv_spec, kv_spec],
        out_specs=q_spec,
        scratch_shapes=[pltpu.VMEM((t, num_heads), jnp.float32),   # running max
                        pltpu.VMEM((t, num_heads), jnp.float32),   # running sum
                        pltpu.VMEM((t, hidden), jnp.float32)],     # f32 acc
        compiler_params=_cparams(("parallel", "parallel", "arbitrary")),
    )(q2d, k2d, v2d)


# ----------------------------- forward wrappers -------------------------------

def mot_attention_anchor_forward(x, params, *, num_heads, eps=LN_EPS, tm=256):
    """Anchor-layer path.  Returns (output, attn_weights, present, routing_score,
    routing_states) like the PyTorch forward (attn_weights/present are None)."""
    bsz, q_len, hidden = x.shape
    head_dim = hidden // num_heads
    n = bsz * q_len
    x2d = x.reshape(n, hidden)

    tm_eff = min(tm, _round_up(n, 8))
    n_pad = _round_up(n, tm_eff)
    xp = _pad_rows(x2d, n_pad)     # padded rows: LN with var=0 uses rsqrt(eps)>0, sliced off

    ln_g = params["ln_g"].reshape(1, hidden).astype(jnp.float32)
    ln_b = params["ln_b"].reshape(1, hidden).astype(jnp.float32)
    w_attn = params["w_attn"].astype(jnp.bfloat16)
    b_attn = params["b_attn"].reshape(1, 3 * hidden).astype(jnp.float32)
    w_proj = params["w_proj"].astype(jnp.bfloat16)
    b_proj = params["b_proj"].reshape(1, hidden).astype(jnp.float32)

    # LN -> c_attn (fused); bf16 q/k/v intermediates.
    # TODO(synk): tile the 3H weight axis for hidden >~ 2048 (v7x VMEM).
    q2d, k2d, v2d = pl.pallas_call(
        functools.partial(_ln_qkv_kernel, eps=eps, hidden=hidden),
        out_shape=tuple(jax.ShapeDtypeStruct((n_pad, hidden), jnp.bfloat16)
                        for _ in range(3)),
        grid=(n_pad // tm_eff,),
        in_specs=[
            pl.BlockSpec((tm_eff, hidden), lambda i: (i, 0)),
            pl.BlockSpec((1, hidden), lambda i: (0, 0)),
            pl.BlockSpec((1, hidden), lambda i: (0, 0)),
            pl.BlockSpec((hidden, 3 * hidden), lambda i: (0, 0)),
            pl.BlockSpec((1, 3 * hidden), lambda i: (0, 0)),
        ],
        out_specs=tuple(pl.BlockSpec((tm_eff, hidden), lambda i: (i, 0))
                        for _ in range(3)),
        compiler_params=_cparams(("parallel",)),
    )(xp, ln_g, ln_b, w_attn, b_attn)

    attn2d = _causal_mha(q2d[:n], k2d[:n], v2d[:n], bsz, q_len, num_heads, head_dim)

    ap = _pad_rows(attn2d, n_pad)
    out2d = pl.pallas_call(
        _proj_kernel,
        out_shape=jax.ShapeDtypeStruct((n_pad, hidden), x.dtype),
        grid=(n_pad // tm_eff,),
        in_specs=[
            pl.BlockSpec((tm_eff, hidden), lambda i: (i, 0)),
            pl.BlockSpec((hidden, hidden), lambda i: (0, 0)),
            pl.BlockSpec((1, hidden), lambda i: (0, 0)),
        ],
        out_specs=pl.BlockSpec((tm_eff, hidden), lambda i: (i, 0)),
        compiler_params=_cparams(("parallel",)),
    )(ap, w_proj, b_proj)[:n]

    # resid_dropout: identity (eval).  use_cache=False -> present=None.
    return out2d.reshape(bsz, q_len, hidden), None, None, None, None


def mot_attention_expert_forward(x, params, *, num_heads, eps=LN_EPS, tm=256):
    """Non-anchor (MoT) path with routing_all_possible_path=True, weighted_qkv=True.
    Returns (output, attn_weights, present, routing_score, routing_states)."""
    bsz, q_len, hidden = x.shape
    head_dim = hidden // num_heads
    num_attn = params["w_attn"].shape[0]
    n = bsz * q_len
    x2d = x.reshape(n, hidden)

    tm_eff = min(tm, _round_up(n, 8))
    n_pad = _round_up(n, tm_eff)
    xp = _pad_rows(x2d, n_pad)

    router_w = params["router_w"].astype(jnp.float32)
    router_b = params["router_b"].reshape(1, num_attn).astype(jnp.float32)
    ln_g = params["ln_g"].reshape(num_attn, 1, hidden).astype(jnp.float32)
    ln_b = params["ln_b"].reshape(num_attn, 1, hidden).astype(jnp.float32)
    w_attn = params["w_attn"].astype(jnp.bfloat16)
    b_attn = params["b_attn"].reshape(num_attn, 1, 3 * hidden).astype(jnp.float32)
    w_proj = params["w_proj"].astype(jnp.bfloat16)
    b_proj = params["b_proj"].reshape(num_attn, 1, hidden).astype(jnp.float32)

    # qkv mixture: router + LN stats + sum_e score_e * c_attn_e(LN_e(x)) fused.
    # Expert weights are grid-invariant blocks (DMA'd once per kernel).
    # TODO(synk): for hidden >~ 2048 stream/tile the (E, H, 3H) stack along 3H
    # instead of keeping it VMEM-resident (v7x has 64 MiB VMEM).
    q2d, k2d, v2d, scores_pad = pl.pallas_call(
        functools.partial(_mot_qkv_kernel, eps=eps, num_attn=num_attn, hidden=hidden),
        out_shape=(jax.ShapeDtypeStruct((n_pad, hidden), jnp.bfloat16),
                   jax.ShapeDtypeStruct((n_pad, hidden), jnp.bfloat16),
                   jax.ShapeDtypeStruct((n_pad, hidden), jnp.bfloat16),
                   jax.ShapeDtypeStruct((n_pad, num_attn), jnp.float32)),
        grid=(n_pad // tm_eff,),
        in_specs=[
            pl.BlockSpec((tm_eff, hidden), lambda i: (i, 0)),                    # x tile
            pl.BlockSpec((hidden, num_attn), lambda i: (0, 0)),                  # router W
            pl.BlockSpec((1, num_attn), lambda i: (0, 0)),                       # router b
            pl.BlockSpec((num_attn, 1, hidden), lambda i: (0, 0, 0)),            # ln gamma
            pl.BlockSpec((num_attn, 1, hidden), lambda i: (0, 0, 0)),            # ln beta
            pl.BlockSpec((num_attn, hidden, 3 * hidden), lambda i: (0, 0, 0)),   # W_attn
            pl.BlockSpec((num_attn, 1, 3 * hidden), lambda i: (0, 0, 0)),        # b_attn
        ],
        out_specs=(pl.BlockSpec((tm_eff, hidden), lambda i: (i, 0)),
                   pl.BlockSpec((tm_eff, hidden), lambda i: (i, 0)),
                   pl.BlockSpec((tm_eff, hidden), lambda i: (i, 0)),
                   pl.BlockSpec((tm_eff, num_attn), lambda i: (i, 0))),
        compiler_params=_cparams(("parallel",)),
    )(xp, router_w, router_b, ln_g, ln_b, w_attn, b_attn)

    attn2d = _causal_mha(q2d[:n], k2d[:n], v2d[:n], bsz, q_len, num_heads, head_dim)

    # output mixture: sum_e score_e * c_proj_e(attn_out)
    ap = _pad_rows(attn2d, n_pad)
    out2d = pl.pallas_call(
        functools.partial(_mot_proj_kernel, num_attn=num_attn),
        out_shape=jax.ShapeDtypeStruct((n_pad, hidden), x.dtype),
        grid=(n_pad // tm_eff,),
        in_specs=[
            pl.BlockSpec((tm_eff, hidden), lambda i: (i, 0)),
            pl.BlockSpec((tm_eff, num_attn), lambda i: (i, 0)),
            pl.BlockSpec((num_attn, hidden, hidden), lambda i: (0, 0, 0)),
            pl.BlockSpec((num_attn, 1, hidden), lambda i: (0, 0, 0)),
        ],
        out_specs=pl.BlockSpec((tm_eff, hidden), lambda i: (i, 0)),
        compiler_params=_cparams(("parallel",)),
    )(ap, scores_pad, w_proj, b_proj)[:n]

    # TODO(synk): layer_past / use_cache KV concat, attention_mask/head_mask and the
    # top-k sparse dispatch (routing_all_possible_path=False) are not implemented.
    scores = scores_pad[:n]
    return (out2d.reshape(bsz, q_len, hidden), None, None,
            scores.reshape(bsz, q_len, num_attn), None)


# ----------------------------- pure-JAX references ----------------------------

def _bf16_dot(a, w, b):
    return jnp.dot(a.astype(jnp.bfloat16), w.astype(jnp.bfloat16),
                   preferred_element_type=jnp.float32) + b[None, :]


def _mha_ref(q2d, k2d, v2d, bsz, q_len, num_heads, head_dim):
    hidden = num_heads * head_dim

    def sh(t):
        return (t.astype(jnp.bfloat16)
                 .reshape(bsz, q_len, num_heads, head_dim).transpose(0, 2, 1, 3))

    q, k, v = sh(q2d), sh(k2d), sh(v2d)
    scale = 1.0 / math.sqrt(head_dim)
    s = jnp.einsum("bhqd,bhkd->bhqk", q, k,
                   preferred_element_type=jnp.float32) * scale
    row = jax.lax.broadcasted_iota(jnp.int32, (q_len, q_len), 0)
    col = jax.lax.broadcasted_iota(jnp.int32, (q_len, q_len), 1)
    s = jnp.where((col <= row)[None, None], s, jnp.finfo(jnp.float32).min)
    p = _softmax_lastdim(s)
    o = jnp.einsum("bhqk,bhkd->bhqd", p.astype(jnp.bfloat16), v,
                   preferred_element_type=jnp.float32)
    return o.transpose(0, 2, 1, 3).reshape(bsz * q_len, hidden)


def _anchor_ref(x, p, num_heads, eps=LN_EPS):
    bsz, q_len, hidden = x.shape
    head_dim = hidden // num_heads
    x2d = x.reshape(-1, hidden)
    h = _layernorm(x2d, p["ln_g"][None, :], p["ln_b"][None, :], eps)
    qkv = _bf16_dot(h, p["w_attn"], p["b_attn"])
    q, k, v = jnp.split(qkv.astype(jnp.bfloat16), 3, axis=-1)
    a = _mha_ref(q, k, v, bsz, q_len, num_heads, head_dim).astype(jnp.bfloat16)
    out = _bf16_dot(a, p["w_proj"], p["b_proj"])
    return out.reshape(bsz, q_len, hidden)


def _expert_ref(x, p, num_heads, eps=LN_EPS):
    bsz, q_len, hidden = x.shape
    head_dim = hidden // num_heads
    x2d = x.reshape(-1, hidden).astype(jnp.float32)
    scores = jax.nn.softmax(x2d @ p["router_w"] + p["router_b"], axis=-1)
    num_attn = p["w_attn"].shape[0]

    qkv = jnp.zeros((x2d.shape[0], 3 * hidden), jnp.float32)
    for e in range(num_attn):
        h = _layernorm(x2d, p["ln_g"][e][None, :], p["ln_b"][e][None, :], eps)
        qkv = qkv + _bf16_dot(h, p["w_attn"][e], p["b_attn"][e]) * scores[:, e:e + 1]

    q, k, v = jnp.split(qkv.astype(jnp.bfloat16), 3, axis=-1)
    a = _mha_ref(q, k, v, bsz, q_len, num_heads, head_dim).astype(jnp.bfloat16)

    out = jnp.zeros((x2d.shape[0], hidden), jnp.float32)
    for e in range(num_attn):
        out = out + _bf16_dot(a, p["w_proj"][e], p["b_proj"][e]) * scores[:, e:e + 1]
    return out.reshape(bsz, q_len, hidden), scores.reshape(bsz, q_len, num_attn)


# --------------------------------- main ----------------------------------------

if __name__ == "__main__":
    B, T, H = 2, 8, 32          # bsz, q_len, hidden_size
    NH = 4                      # num_attention_heads -> head_dim = 8
    E = 4                       # num_attn (experts)

    key = jax.random.PRNGKey(0)
    ks = jax.random.split(key, 16)
    nrm = jax.random.normal

    x = nrm(ks[0], (B, T, H), jnp.float32)

    anchor_params = dict(
        ln_g=1.0 + 0.1 * nrm(ks[1], (H,), jnp.float32),
        ln_b=0.1 * nrm(ks[2], (H,), jnp.float32),
        w_attn=0.02 * nrm(ks[3], (H, 3 * H), jnp.float32),
        b_attn=0.02 * nrm(ks[4], (3 * H,), jnp.float32),
        w_proj=0.02 * nrm(ks[5], (H, H), jnp.float32),
        b_proj=0.02 * nrm(ks[6], (H,), jnp.float32),
    )

    mot_params = dict(
        ln_g=1.0 + 0.1 * nrm(ks[7], (E, H), jnp.float32),
        ln_b=0.1 * nrm(ks[8], (E, H), jnp.float32),
        w_attn=0.02 * nrm(ks[9], (E, H, 3 * H), jnp.float32),
        b_attn=0.02 * nrm(ks[10], (E, 3 * H), jnp.float32),
        w_proj=0.02 * nrm(ks[11], (E, H, H), jnp.float32),
        b_proj=0.02 * nrm(ks[12], (E, H), jnp.float32),
        router_w=0.02 * nrm(ks[13], (H, E), jnp.float32),
        router_b=jnp.zeros((E,), jnp.float32),
    )

    # anchor path
    out_a, _, _, score_a, _ = mot_attention_anchor_forward(x, anchor_params, num_heads=NH)
    out_a = jax.block_until_ready(out_a)
    np.testing.assert_allclose(np.asarray(out_a),
                               np.asarray(_anchor_ref(x, anchor_params, NH)),
                               rtol=5e-3, atol=2e-3)

    # expert (MoT, all-possible-paths) path
    out_e, _, _, score_e, _ = mot_attention_expert_forward(x, mot_params, num_heads=NH)
    out_e = jax.block_until_ready(out_e)
    ref_e, ref_score = _expert_ref(x, mot_params, NH)
    np.testing.assert_allclose(np.asarray(out_e), np.asarray(ref_e),
                               rtol=5e-3, atol=2e-3)
    np.testing.assert_allclose(np.asarray(score_e), np.asarray(ref_score),
                               rtol=1e-3, atol=1e-3)

    print("KERNEL_OK")
</pallas_src>

<mosaic_0001>
module attributes {stable_mosaic.version = 11 : i64} {
  func.func @_ln_qkv_kernel(%arg0: i32, %arg1: memref<16x32xf32, #tpu.memory_space<vmem>>, %arg2: memref<1x32xf32, #tpu.memory_space<vmem>>, %arg3: memref<1x32xf32, #tpu.memory_space<vmem>>, %arg4: memref<32x96xbf16, #tpu.memory_space<vmem>>, %arg5: memref<1x96xf32, #tpu.memory_space<vmem>>, %arg6: memref<16x32xbf16, #tpu.memory_space<vmem>>, %arg7: memref<16x32xbf16, #tpu.memory_space<vmem>>, %arg8: memref<16x32xbf16, #tpu.memory_space<vmem>>) attributes {dimension_semantics = [#tpu.dimension_semantics<parallel>], iteration_bounds = array<i64: 1>, scalar_prefetch = 0 : i64, scratch_operands = 0 : i64, tpu.core_type = #tpu.core_type<tc>, window_params = [{transform_indices = @transform_0, window_bounds = array<i64: 16, 32>}, {pipeline_mode = #tpu.pipeline_mode<synchronous>, transform_indices = @transform_1, window_bounds = array<i64: 1, 32>}, {pipeline_mode = #tpu.pipeline_mode<synchronous>, transform_indices = @transform_2, window_bounds = array<i64: 1, 32>}, {pipeline_mode = #tpu.pipeline_mode<synchronous>, transform_indices = @transform_3, window_bounds = array<i64: 32, 96>}, {pipeline_mode = #tpu.pipeline_mode<synchronous>, transform_indices = @transform_4, window_bounds = array<i64: 1, 96>}, {transform_indices = @transform_5, window_bounds = array<i64: 16, 32>}, {transform_indices = @transform_6, window_bounds = array<i64: 16, 32>}, {transform_indices = @transform_7, window_bounds = array<i64: 16, 32>}]} {
    %c0 = arith.constant 0 : index
    %c0_0 = arith.constant 0 : index
    %0 = vector.load %arg1[%c0, %c0_0] : memref<16x32xf32, #tpu.memory_space<vmem>>, vector<16x32xf32>
    %c0_1 = arith.constant 0 : index
    %c0_2 = arith.constant 0 : index
    %1 = vector.load %arg2[%c0_1, %c0_2] : memref<1x32xf32, #tpu.memory_space<vmem>>, vector<1x32xf32>
    %c0_3 = arith.constant 0 : index
    %c0_4 = arith.constant 0 : index
    %2 = vector.load %arg3[%c0_3, %c0_4] : memref<1x32xf32, #tpu.memory_space<vmem>>, vector<1x32xf32>
    %cst = arith.constant dense<0.000000e+00> : vector<16xf32>
    %3 = vector.multi_reduction <add>, %0, %cst [1] : vector<16x32xf32> to vector<16xf32>
    %4 = vector.shape_cast %3 : vector<16xf32> to vector<16x1xf32>
    %cst_5 = arith.constant 3.200000e+01 : f32
    %5 = vector.broadcast %cst_5 : f32 to vector<16x1xf32>
    %6 = arith.divf %4, %5 : vector<16x1xf32>
    %7 = vector.broadcast %6 : vector<16x1xf32> to vector<16x32xf32>
    %8 = arith.subf %0, %7 : vector<16x32xf32>
    %9 = arith.mulf %8, %8 : vector<16x32xf32>
    %cst_6 = arith.constant dense<0.000000e+00> : vector<16xf32>
    %10 = vector.multi_reduction <add>, %9, %cst_6 [1] : vector<16x32xf32> to vector<16xf32>
    %11 = vector.shape_cast %10 : vector<16xf32> to vector<16x1xf32>
    %cst_7 = arith.constant 3.200000e+01 : f32
    %12 = vector.broadcast %cst_7 : f32 to vector<16x1xf32>
    %13 = arith.divf %11, %12 : vector<16x1xf32>
    %14 = vector.broadcast %6 : vector<16x1xf32> to vector<16x32xf32>
    %15 = arith.subf %0, %14 : vector<16x32xf32>
    %cst_8 = arith.constant 9.99999974E-6 : f32
    %16 = vector.broadcast %cst_8 : f32 to vector<16x1xf32>
    %17 = arith.addf %13, %16 : vector<16x1xf32>
    %18 = math.rsqrt %17 : vector<16x1xf32>
    %19 = vector.broadcast %18 : vector<16x1xf32> to vector<16x32xf32>
    %20 = arith.mulf %15, %19 : vector<16x32xf32>
    %21 = vector.broadcast %1 : vector<1x32xf32> to vector<16x32xf32>
    %22 = arith.mulf %20, %21 : vector<16x32xf32>
    %23 = vector.broadcast %2 : vector<1x32xf32> to vector<16x32xf32>
    %24 = arith.addf %22, %23 : vector<16x32xf32>
    %25 = arith.truncf %24 : vector<16x32xf32> to vector<16x32xbf16>
    %c0_9 = arith.constant 0 : index
    %c0_10 = arith.constant 0 : index
    %26 = vector.load %arg4[%c0_9, %c0_10] : memref<32x96xbf16, #tpu.memory_space<vmem>>, vector<32x96xbf16>
    %cst_11 = arith.constant dense<0.000000e+00> : vector<16x96xf32>
    %27 = tpu.matmul %25, %26, %cst_11 {dimension_numbers = #tpu.dot_dimension_numbers<[1], [0], [0], [1], [0, 0, 1, 1], [], []>} : vector<16x32xbf16>, vector<32x96xbf16>, vector<16x96xf32> -> vector<16x96xf32>
    %c0_12 = arith.constant 0 : index
    %c0_13 = arith.constant 0 : index
    %28 = vector.load %arg5[%c0_12, %c0_13] : memref<1x96xf32, #tpu.memory_space<vmem>>, vector<1x96xf32>
    %29 = vector.broadcast %28 : vector<1x96xf32> to vector<16x96xf32>
    %30 = arith.addf %27, %29 : vector<16x96xf32>
    %31 = vector.extract_strided_slice %30 {offsets = [0, 0], sizes = [16, 32], strides = [1, 1]} : vector<16x96xf32> to vector<16x32xf32>
    %32 = arith.truncf %31 : vector<16x32xf32> to vector<16x32xbf16>
    %c0_14 = arith.constant 0 : index
    %c0_15 = arith.constant 0 : index
    %33 = vector.load %arg6[%c0_14, %c0_15] : memref<16x32xbf16, #tpu.memory_space<vmem>>, vector<16x32xbf16>
    tpu.vector_store %arg6[%c0_14, %c0_15], %32 {strides = array<i32>} : memref<16x32xbf16, #tpu.memory_space<vmem>>, vector<16x32xbf16>,
    %34 = vector.extract_strided_slice %30 {offsets = [0, 32], sizes = [16, 32], strides = [1, 1]} : vector<16x96xf32> to vector<16x32xf32>
    %35 = arith.truncf %34 : vector<16x32xf32> to vector<16x32xbf16>
    %c0_16 = arith.constant 0 : index
    %c0_17 = arith.constant 0 : index
    %36 = vector.load %arg7[%c0_16, %c0_17] : memref<16x32xbf16, #tpu.memory_space<vmem>>, vector<16x32xbf16>
    tpu.vector_store %arg7[%c0_16, %c0_17], %35 {strides = array<i32>} : memref<16x32xbf16, #tpu.memory_space<vmem>>, vector<16x32xbf16>,
    %37 = vector.extract_strided_slice %30 {offsets = [0, 64], sizes = [16, 32], strides = [1, 1]} : vector<16x96xf32> to vector<16x32xf32>
    %38 = arith.truncf %37 : vector<16x32xf32> to vector<16x32xbf16>
    %c0_18 = arith.constant 0 : index
    %c0_19 = arith.constant 0 : index
    %39 = vector.load %arg8[%c0_18, %c0_19] : memref<16x32xbf16, #tpu.memory_space<vmem>>, vector<16x32xbf16>
    tpu.vector_store %arg8[%c0_18, %c0_19], %38 {strides = array<i32>} : memref<16x32xbf16, #tpu.memory_space<vmem>>, vector<16x32xbf16>,
    return
  }
  func.func @transform_0(%arg0: i32) -> (i32, i32) {
    %c0_i32 = arith.constant 0 : i32
    %c0_i32_0 = arith.constant 0 : i32
    return %arg0, %c0_i32 : i32, i32
  }
  func.func @transform_1(%arg0: i32) -> (i32, i32) {
    %c0_i32 = arith.constant 0 : i32
    %c0_i32_0 = arith.constant 0 : i32
    %c0_i32_1 = arith.constant 0 : i32
    return %c0_i32, %c0_i32_0 : i32, i32
  }
  func.func @transform_2(%arg0: i32) -> (i32, i32) {
    %c0_i32 = arith.constant 0 : i32
    %c0_i32_0 = arith.constant 0 : i32
    %c0_i32_1 = arith.constant 0 : i32
    return %c0_i32, %c0_i32_0 : i32, i32
  }
  func.func @transform_3(%arg0: i32) -> (i32, i32) {
    %c0_i32 = arith.constant 0 : i32
    %c0_i32_0 = arith.constant 0 : i32
    %c0_i32_1 = arith.constant 0 : i32
    return %c0_i32, %c0_i32_0 : i32, i32
  }
  func.func @transform_4(%arg0: i32) -> (i32, i32) {
    %c0_i32 = arith.constant 0 : i32
    %c0_i32_0 = arith.constant 0 : i32
    %c0_i32_1 = arith.constant 0 : i32
    return %c0_i32, %c0_i32_0 : i32, i32
  }
  func.func @transform_5(%arg0: i32) -> (i32, i32) {
    %c0_i32 = arith.constant 0 : i32
    %c0_i32_0 = arith.constant 0 : i32
    return %arg0, %c0_i32 : i32, i32
  }
  func.func @transform_6(%arg0: i32) -> (i32, i32) {
    %c0_i32 = arith.constant 0 : i32
    %c0_i32_0 = arith.constant 0 : i32
    return %arg0, %c0_i32 : i32, i32
  }
  func.func @transform_7(%arg0: i32) -> (i32, i32) {
    %c0_i32 = arith.constant 0 : i32
    %c0_i32_0 = arith.constant 0 : i32
    return %arg0, %c0_i32 : i32, i32
  }
}

</mosaic_0001>

<bundles_post_ra>
// kernel: tpu_custom_call.1
= control target key start
LH: loop header
LB: loop body
LE: loop exit
PB: predicated region body
PF: predicated region fallthrough
CT: control target
= control target key end

     0   :  { %13 = vsyncpa [#allocation3], 0  ;;  %s538_s0 = inlined_call_operand.hbm [shape: f32[16,32], index: 0, kind: input, shape index: {}]   ;;  %s539_s1 = inlined_call_operand.hbm [shape: f32[1,32], index: 1, kind: input, shape index: {}]   ;;  %s540_s2 = inlined_call_operand.vmem [shape: f32[1,32], index: 2, kind: input, shape index: {}]   ;;  %s541_s3 = inlined_call_operand.hbm [shape: bf16[32,96], index: 3, kind: input, shape index: {}]   ;;  %s542_s4 = inlined_call_operand.vmem [shape: f32[1,96], index: 4, kind: input, shape index: {}]   ;;  %s543_s5 = inlined_call_operand.hbm [shape: bf16[16,32], index: 5, kind: output, shape index: {0}]   ;;  %s544_s6 = inlined_call_operand.hbm [shape: bf16[16,32], index: 6, kind: output, shape index: {1}]   ;;  %s545_s7 = inlined_call_operand.hbm [shape: bf16[16,32], index: 7, kind: output, shape index: {2}]  }
   0x1   :  { %14 = vsyncpa [#allocation6], 0 }
   0x2   :  { %15 = vsyncpa [#allocation4], 0  ;;  %s35_s26 = sshll.u32 %s539_s1, 4  ;;  %s36_s26 = int_to_ptr.hbm [resolvable:$true] %s35_s26 }
   0x3   :  { %16 = vsyncpa [#allocation10], 0  ;;  %s437_s27 = smov [#allocation5]   ;;  %s21_s8 = sshll.u32 %s538_s0, 4  ;;  %s22_s8 = int_to_ptr.hbm [resolvable:$true] %s21_s8 }
   0x4   :  { %s37_s28 = sshll.u32 %s437_s27, 4  ;;  %s438_s9 = smov [#allocation2]   ;;  %s38_s28 = int_to_ptr.vmem [resolvable:$true] %s37_s28 }
   0x5   :  { %40 = dma.hbm_to_vmem [thread:$0]  %s36_s26, 16, %s38_s28, [#allocation6]  }
   0x6   :  { %s23_s10 = sshll.u32 %s438_s9, 4  ;;  %s439_s11 = smov 128   ;;  %s24_s10 = int_to_ptr.vmem [resolvable:$true] %s23_s10 }
   0x7   :  { %s440_s12 = smov 8   ;;  %s47_s1 = sshll.u32 %s541_s3, 4  ;;  %s48_s1 = int_to_ptr.hbm [resolvable:$true] %s47_s1 }
   0x8   :  { %29 = dma.hbm_to_vmem [thread:$0]  %s22_s8, 256, %s24_s10, [#allocation3], %s439_s11, %s439_s11, %s440_s12  }
   0x9   :  { %s441_s15 = smov [#allocation7]   ;;  %s442_s17 = smov 64  }
   0xa   :  { %s49_s16 = sshll.u32 %s441_s15, 4  ;;  %s443_s18 = smov 4   ;;  %s50_s16 = int_to_ptr.vmem [resolvable:$true] %s49_s16 }
   0xb   :  { %55 = dma.hbm_to_vmem [thread:$0]  %s48_s1, 256, %s50_s16, [#allocation6], %s442_s17, %s442_s17, %s443_s18  }
   0xc   :  { %429 = dma.done.wait [#allocation3], 256  }
   0xd   :  { %430 = vsyncadd [#allocation3], 4294967040 }
   0xe   :  { %431 = dma.done.wait [#allocation6], 272  }
   0xf   :  { %432 = vsyncadd [#allocation6], 4294967024  ;;  %vm75_vm0 = vcmask 261120   ;;  %v71_v0 = vld [vmem:[#allocation2] sm:$0xff]  ;;  %v72_v2 = vld [vmem:[#allocation2 + $0x8] sm:$0xff]  ;;  %v444_v4 = vmov 32.0  }
  0x10   :  { %v76_v1 = vsel %vm75_vm0, %v71_v0, 0.0  ;;  %v79_v3 = vsel %vm75_vm0, %v72_v2, 0.0  ;;  %279 = vrcp.f32 %v444_v4  ;;  %v263_v21 = vld [vmem:[#allocation7 + $0x8] sm:$0xff]  ;;  %v262_v23 = vld [vmem:[#allocation7] sm:$0xff]  ;;  %v276_v42 = vld [vmem:[#allocation5] ss:$0 sm:$0xff] }
  0x11   :  { %77 = vadd.xlane.f32.xlu0 %v76_v1  ;;  %167 = vmatpush.bf16.msra.mxu0 %v263_v21  ;;  %v277_v47 = vld [vmem:[%s540_s2] ss:$0 sm:$0xff]  ;;  %vm177_vm8 = vcmask 257024   ;;  %s445_s21 = smov 96   ;;  %s446_s2 = smov [#allocation8]  }
  0x12   :  { %v278_v52 = vld [vmem:[%s542_s4] ss:$0 sm:$0xff]  ;;  %s202_s22 = sshll.u32 %s446_s2, 4  ;;  %s204_s25 = sshll.u32 %s543_s5, 4  ;;  %s203_s22 = int_to_ptr.vmem [resolvable:$true] %s202_s22  ;;  %s205_s25 = int_to_ptr.hbm [resolvable:$true] %s204_s25 }
  0x13   :  { %s447_s4 = smov [#allocation9]   ;;  %s217_s28 = sshll.u32 %s544_s6, 4  ;;  %s218_s28 = int_to_ptr.hbm [resolvable:$true] %s217_s28 }
  0x14   :  { %s215_s26 = sshll.u32 %s447_s4, 4  ;;  %s448_s29 = smov [#allocation11]   ;;  %s216_s26 = int_to_ptr.vmem [resolvable:$true] %s215_s26 }
  0x15   :  { %168 = vmatpush.bf16.msra.mxu0 %v262_v23  ;;  %s228_s30 = sshll.u32 %s448_s29, 4  ;;  %s230_s10 = sshll.u32 %s545_s7, 4  ;;  %s229_s30 = int_to_ptr.vmem [resolvable:$true] %s228_s30  ;;  %s231_s10 = int_to_ptr.hbm [resolvable:$true] %s230_s10 }
  0x16   :  { %v280_v5 = vpop.eup %279 }
  0x17   :  { %v83_v6 = vmul.f32 32.0, %v280_v5  ;;  %vm87_vm1 = vweird.f32 %v280_v5 }
  0x19   :  { %80 = vadd.xlane.f32.xlu0 %v79_v3  ;;  %v84_v7 = vsub.f32 1.0, %v83_v6 }
  0x1b   :  { %v85_v8 = vmul.f32 %v280_v5, %v84_v7 }
  0x1d   :  { %v86_v9 = vadd.f32 %v280_v5, %v85_v8 }
  0x1f   :  { %v88_v10 = vsel %vm87_vm1, %v280_v5, %v86_v9 }
  0x84   :  { %v78_v11 = vpop.xlane.xlu0 %77 }
  0x85   :  { %v89_v12 = vmul.f32 %v88_v10, %v78_v11 }
  0x87   :  { %v91_v13 = vsub.f32 %v71_v0, %v89_v12 }
  0x89   :  { %v93_v14 = vmul.f32 %v91_v13, %v91_v13 }
  0x8b   :  { %v95_v15 = vsel %vm75_vm0, %v93_v14, 0.0 }
  0x8c   :  { %96 = vadd.xlane.f32.xlu1 %v95_v15  ;;  %v81_v16 = vpop.xlane.xlu0 %80 }
  0x8d   :  { %v90_v17 = vmul.f32 %v88_v10, %v81_v16 }
  0x8f   :  { %v92_v18 = vsub.f32 %v72_v2, %v90_v17 }
  0x91   :  { %v94_v19 = vmul.f32 %v92_v18, %v92_v18 }
  0x93   :  { %v98_v20 = vsel %vm75_vm0, %v94_v19, 0.0 }
  0x94   :  { %99 = vadd.xlane.f32.xlu1 %v98_v20 }
  0xff   :  { %v97_v22 = vpop.xlane.xlu1 %96 }
 0x100   :  { %v101_v24 = vmul.f32 %v97_v22, %v88_v10 }
 0x102   :  { %v103_v25 = vadd.f32 1e-05, %v101_v24 }
 0x104   :  { %281 = vrsqrt.f32 %v103_v25  ;;  %vm111_vm3 = vweird.f32 %v103_v25 }
 0x107   :  { %v100_v26 = vpop.xlane.xlu1 %99 }
 0x108   :  { %v102_v27 = vmul.f32 %v100_v26, %v88_v10 }
 0x10a   :  { %v282_v28 = vpop.eup %281  ;;  %v104_v29 = vadd.f32 1e-05, %v102_v27 }
 0x10b   :  { %v106_v30 = vmul.f32 %v282_v28, %v103_v25  ;;  %vm112_vm2 = vweird.f32 %v282_v28 }
 0x10c   :  { %283 = vrsqrt.f32 %v104_v29  ;;  %vm113_vm4 = vmor %vm111_vm3, %vm112_vm2  ;;  %vm121_vm6 = vweird.f32 %v104_v29 }
 0x10d   :  { %v107_v31 = vmul.f32 %v282_v28, %v106_v30 }
 0x10f   :  { %v108_v32 = vmul.f32 0.5, %v107_v31 }
 0x111   :  { %v109_v33 = vsub.f32 1.5, %v108_v32 }
 0x112   :  { %v284_v34 = vpop.eup %283 }
 0x113   :  { %v110_v35 = vmul.f32 %v282_v28, %v109_v33  ;;  %v116_v36 = vmul.f32 %v284_v34, %v104_v29  ;;  %vm122_vm5 = vweird.f32 %v284_v34 }
 0x114   :  { %vm123_vm7 = vmor %vm121_vm6, %vm122_vm5 }
 0x115   :  { %v117_v37 = vmul.f32 %v284_v34, %v116_v36  ;;  %v114_v38 = vsel %vm113_vm4, %v282_v28, %v110_v35 }
 0x116   :  { %v125_v41 = vmul.f32 %v114_v38, %v91_v13 }
 0x117   :  { %v118_v39 = vmul.f32 0.5, %v117_v37 }
 0x118   :  { %v130_v46 = vmul.f32 %v276_v42, %v125_v41 }
 0x119   :  { %v119_v40 = vsub.f32 1.5, %v118_v39 }
 0x11a   :  { %v135_v49 = vadd.f32 %v277_v47, %v130_v46 }
 0x11b   :  { %v120_v43 = vmul.f32 %v284_v34, %v119_v40 }
 0x11d   :  { %v124_v44 = vsel %vm123_vm7, %v284_v34, %v120_v43 }
 0x11e   :  { %v126_v45 = vmul.f32 %v124_v44, %v92_v18 }
 0x120   :  { %v131_v48 = vmul.f32 %v276_v42, %v126_v45 }
 0x122   :  { %v136_v50 = vadd.f32 %v277_v47, %v131_v48 }
 0x124   :  { %v137_v51 = vpack.c.bf16 %v136_v50, %v135_v49 }
 0x126   :  { %261 = vmatmul.msk.bf16.vlgmr.msra.gmra.mxu0 %vm75_vm0, %v137_v51 }
 0x1a3   :  { %v170_v53 = vpop.f32.mrf.mxu0 }
 0x1a4   :  { %v171_v54 = vadd.f32 %v278_v52, %v170_v53 }
 0x1a6   :  { %v175_v55 = vpack.c.bf16 %v171_v54, %v171_v54 }
 0x1a8   :  { %178 = vst.msk [vmem:[#allocation8] sm:$0xf] %vm177_vm8, %v175_v55  ;;  %190 = vrot.lane.b32.xlu0 %v175_v55, %s442_s17  ;;  %182 = vrot.lane.b32.xlu2 %v175_v55, %s445_s21 }
 0x1ab   :  { %v172_v56 = vpop.f32.mrf.mxu0 }
 0x1ac   :  { %v173_v57 = vadd.f32 %v278_v52, %v172_v56 }
 0x1ae   :  { %v176_v58 = vpack.c.bf16 %v173_v57, %v173_v57 }
 0x1b0   :  { %179 = vst.msk [vmem:[#allocation8 + $0x4] sm:$0xf] %vm177_vm8, %v176_v58  ;;  %192 = vrot.lane.b32.xlu1 %v176_v58, %s442_s17  ;;  %184 = vrot.lane.b32.xlu2 %v176_v58, %s445_s21 }
 0x1b1   :  { %210 = dma.vmem_to_hbm [thread:$0]  %s203_s22, 128, %s205_s25, [#allocation4], %s442_s17, %s442_s17, %s443_s18  }
 0x202   :  { %v183_v59 = vpop.permute.xlu2 %182 }
 0x203   :  { %188 = vst.msk [vmem:[#allocation9] sm:$0xf] %vm177_vm8, %v183_v59 }
 0x20a   :  { %v185_v60 = vpop.permute.xlu2 %184 }
 0x20b   :  { %189 = vst.msk [vmem:[#allocation9 + $0x4] sm:$0xf] %vm177_vm8, %v185_v60 }
 0x20c   :  { %223 = dma.vmem_to_hbm [thread:$0]  %s216_s26, 128, %s218_s28, [#allocation10], %s442_s17, %s442_s17, %s443_s18  }
 0x21a   :  { %v191_v61 = vpop.permute.xlu0 %190 }
 0x21b   :  { %196 = vst.msk [vmem:[#allocation11] sm:$0xf] %vm177_vm8, %v191_v61 }
 0x222   :  { %v193_v62 = vpop.permute.xlu1 %192 }
 0x223   :  { %197 = vst.msk [vmem:[#allocation11 + $0x4] sm:$0xf] %vm177_vm8, %v193_v62 }
 0x224   :  { %236 = dma.vmem_to_hbm [thread:$0]  %s229_s30, 128, %s231_s10, [#allocation10], %s442_s17, %s442_s17, %s443_s18  }
 0x225   :  { %433 = dma.done.wait [#allocation4], 128  }
 0x226   :  { %434 = vsyncadd [#allocation4], 4294967168 }
 0x227   :  { %435 = dma.done.wait [#allocation10], 256  }
 0x228   :  { %436 = vsyncadd [#allocation10], 4294967040 }
 0x229   :  { %249 = vsyncpa [#allocation3], 1 }
 0x22a   :  { %250 = vsyncpa [#allocation6], 1 }
 0x22b   :  { %251 = vsyncpa [#allocation4], 1 }
 0x22c   :  { %252 = vsyncpa [#allocation10], 1 }

</bundles_post_ra>
